<compile_context>
chip_gen: v7x
topology: tpu7x:2x2x1
jax: 0.10.0
libtpu: 0.0.40
codegen_flags: <defaults>
</compile_context>

<pallas_src>
import functools
import math

import jax
import jax.numpy as jnp
from jax.experimental import pallas as pl
from jax.experimental.pallas import tpu as pltpu

KERNEL_SET = (2, 3, 6, 7)
KMAX = max(KERNEL_SET)


def _round_up(x, m):
    return ((x + m - 1) // m) * m


def _dilated_inception_kernel(x_ref, w_ref, b_ref, o_ref, *,
                              dilation, kmax, t_in, t_out, nb, compute_dtype):
    """One (batch, node-block) grid step.

    x_ref: (Cin, nb*t_in)     NCHW read directly; (node, time) folded on lanes
    w_ref: (Cout, kmax*Cin)   fused, left-zero-padded taps; column = m*Cin + c
    b_ref: (Cout, 1)          f32 bias
    o_ref: (Cout, nb*t_out)   lane-dense output block
    """
    x = x_ref[...]                                        # (Cin, nb*t_in)
    # 7 left-rotated copies stacked on sublanes:
    #   window[m*Cin + c, p] = x[c, p + dilation*m]
    # for every kept column p = n*t_in + t with t < t_out; the cyclic wrap only
    # lands in columns t >= t_out, which are dropped below.  No lane-splitting
    # reshape is needed here.
    pieces = []
    for m in range(kmax):
        s = dilation * m
        pieces.append(x if s == 0
                      else jnp.concatenate([x[:, s:], x[:, :s]], axis=1))
    window = jnp.concatenate(pieces, axis=0)              # (kmax*Cin, nb*t_in)
    w = w_ref[...]
    if compute_dtype is not None:                         # cast just before dot
        window = window.astype(compute_dtype)
        w = w.astype(compute_dtype)
    # Single MXU matmul; result is already Cout-on-sublanes / lane-dense.
    acc = jnp.dot(w, window, preferred_element_type=jnp.float32)  # (Cout, nb*t_in)
    # Per-node compaction: keep the first t_out of every t_in columns.
    res = jnp.concatenate(
        [acc[:, n * t_in: n * t_in + t_out] for n in range(nb)], axis=1)
    res = res + b_ref[...]
    o_ref[...] = res.astype(o_ref.dtype)


def dilated_inception_pallas(x_nchw, weights, biases, dilation=2,
                             compute_dtype=None, max_node_block=1024):
    """x_nchw: (B, Cin, N, T) as in PyTorch.  Returns (B, Cout, N, T - 6*dilation)."""
    B, Cin, N, T = x_nchw.shape
    cout_b = weights[0].shape[0]
    Cout = cout_b * len(KERNEL_SET)
    Tout = T - dilation * (KMAX - 1)
    assert Tout > 0, "sequence too short for the kernel-7 branch"

    # ---- fuse the 4 branch weights into one (Cout, KMAX*Cin) matrix -----------
    w_rows = []
    for w in weights:                                     # (cout_b, cin, 1, k)
        k = w.shape[-1]
        w_rows.append(jnp.pad(w[:, :, 0, :], ((0, 0), (0, 0), (KMAX - k, 0))))
    w_full = jnp.concatenate(w_rows, axis=0)              # (Cout, Cin, KMAX)
    # column index = m*Cin + c, matching the window row order in the kernel
    w_ok = jnp.transpose(w_full, (0, 2, 1)).reshape(Cout, KMAX * Cin)
    bias = jnp.concatenate(biases, axis=0).reshape(Cout, 1).astype(jnp.float32)

    # ---- hardware-aware block sizing ------------------------------------------
    try:
        vmem_cap = int(getattr(pltpu.get_tpu_info(), "vmem_capacity_bytes",
                               64 * 1024 * 1024))
    except Exception:                                     # interpret mode / old jax
        vmem_cap = 64 * 1024 * 1024
    budget = vmem_cap // 5                                # ~20% of VMEM working set
    r8 = lambda v: _round_up(v, 8)
    per_node = 4 * (2 * r8(Cin) * T                       # double-buffered input
                    + 2 * r8(Cout) * Tout                 # double-buffered output
                    + r8(KMAX * Cin) * T                  # stacked window
                    + r8(Cout) * 2 * (T + Tout))          # acc + compaction temps
    cap = max(1, min(budget // per_node, max_node_block))

    if N <= cap:
        nb, n_pad = N, N                                  # common path: no padding
    else:
        # node tiling: blocks must keep nb*T and nb*Tout multiples of 128.
        # (alignment can push nb slightly above `cap`; both divide 128 so the
        # overshoot is bounded and stays well below vmem_limit_bytes.)
        a1 = 128 // math.gcd(T, 128)
        a2 = 128 // math.gcd(Tout, 128)
        align = a1 * a2 // math.gcd(a1, a2)
        nb = max(align, (cap // align) * align)
        n_pad = _round_up(N, nb)

    # v7x has 2 TensorCores: ensure >=2 grid blocks when legally possible.
    if B * (n_pad // nb) < 2 and nb % 2 == 0:
        half = nb // 2
        if (half * T) % 128 == 0 and (half * Tout) % 128 == 0:
            nb = half

    x_in = x_nchw
    if n_pad > N:
        # TODO(synk): pad only the tail node block (or mask in-kernel) instead of
        # this full-tensor pad pass; only reached when node tiling is required.
        x_in = jnp.pad(x_in, ((0, 0), (0, 0), (0, n_pad - N), (0, 0)))
    x_in = x_in.reshape(B, Cin, n_pad * T)                # free trailing-dim fold

    grid = (B, n_pad // nb)
    out = pl.pallas_call(
        functools.partial(_dilated_inception_kernel, dilation=dilation,
                          kmax=KMAX, t_in=T, t_out=Tout, nb=nb,
                          compute_dtype=compute_dtype),
        out_shape=jax.ShapeDtypeStruct((B, Cout, n_pad * Tout), x_nchw.dtype),
        grid_spec=pltpu.PrefetchScalarGridSpec(
            num_scalar_prefetch=0,
            grid=grid,
            in_specs=[
                pl.BlockSpec((None, Cin, nb * T), lambda b, j: (b, 0, j)),
                pl.BlockSpec((Cout, KMAX * Cin), lambda b, j: (0, 0)),
                pl.BlockSpec((Cout, 1), lambda b, j: (0, 0)),
            ],
            out_specs=pl.BlockSpec((None, Cout, nb * Tout),
                                   lambda b, j: (b, 0, j)),
        ),
        compiler_params=pltpu.CompilerParams(
            dimension_semantics=("parallel", "parallel"),
            vmem_limit_bytes=min(vmem_cap // 2, 96 * 1024 * 1024),
        ),
    )(x_in, w_ok, bias)

    out = out.reshape(B, Cout, n_pad, Tout)               # free trailing-dim split
    if n_pad > N:
        out = out[:, :, :N, :]
    return out


def dilated_inception_reference(x_nchw, weights, biases, dilation=2):
    """Pure-JAX reference matching the PyTorch forward exactly."""
    outs = []
    for w, b in zip(weights, biases):
        y = jax.lax.conv_general_dilated(
            x_nchw, w, window_strides=(1, 1), padding="VALID",
            rhs_dilation=(1, dilation),
            dimension_numbers=("NCHW", "OIHW", "NCHW"))
        outs.append(y + b.reshape(1, -1, 1, 1))
    t_last = outs[-1].shape[-1]
    outs = [o[..., -t_last:] for o in outs]
    return jnp.concatenate(outs, axis=1)


if __name__ == "__main__":
    # NCHW = (batch, cin, num_nodes, seq_len), consistent with the module
    B, CIN, NNODES, T = 2, 4, 16, 16
    COUT_TOTAL = 8                        # divisible by len(kernel_set)=4
    DILATION = 2
    cout_b = COUT_TOTAL // len(KERNEL_SET)

    key = jax.random.PRNGKey(0)
    kx, *kws = jax.random.split(key, 1 + 2 * len(KERNEL_SET))
    x = jax.random.normal(kx, (B, CIN, NNODES, T), dtype=jnp.float32)

    weights, biases = [], []
    for i, kern in enumerate(KERNEL_SET):
        weights.append(0.1 * jax.random.normal(
            kws[2 * i], (cout_b, CIN, 1, kern), dtype=jnp.float32))
        biases.append(0.1 * jax.random.normal(
            kws[2 * i + 1], (cout_b,), dtype=jnp.float32))

    ref = dilated_inception_reference(x, weights, biases, dilation=DILATION)
    Tout = T - DILATION * (KMAX - 1)
    assert ref.shape == (B, COUT_TOTAL, NNODES, Tout)

    # main path: single node block per batch element, f32
    out = jax.block_until_ready(
        dilated_inception_pallas(x, weights, biases, dilation=DILATION))
    assert out.shape == ref.shape
    assert jnp.allclose(out, ref, rtol=1e-4, atol=1e-4), "f32 mismatch vs reference"

    # node-tiling + tail-padding path (force a tiny node block cap)
    out_tiled = jax.block_until_ready(
        dilated_inception_pallas(x, weights, biases, dilation=DILATION,
                                 max_node_block=8))
    assert jnp.allclose(out_tiled, ref, rtol=1e-4, atol=1e-4), "tiled mismatch"

    # in-kernel bf16 compute path (f32 accumulation), looser tolerance
    out_bf16 = jax.block_until_ready(
        dilated_inception_pallas(x, weights, biases, dilation=DILATION,
                                 compute_dtype=jnp.bfloat16))
    assert jnp.allclose(out_bf16, ref, rtol=5e-2, atol=5e-2), "bf16 mismatch"

    print("KERNEL_OK")
</pallas_src>

<mosaic_0001>
module attributes {stable_mosaic.version = 11 : i64} {
  func.func @_dilated_inception_kernel(%arg0: i32, %arg1: i32, %arg2: memref<1x4x256xf32, #tpu.memory_space<vmem>>, %arg3: memref<8x28xf32, #tpu.memory_space<vmem>>, %arg4: memref<8x1xf32, #tpu.memory_space<vmem>>, %arg5: memref<1x8x64xf32, #tpu.memory_space<vmem>>) attributes {dimension_semantics = [#tpu.dimension_semantics<parallel>, #tpu.dimension_semantics<parallel>], iteration_bounds = array<i64: 2, 1>, scalar_prefetch = 0 : i64, scratch_operands = 0 : i64, tpu.core_type = #tpu.core_type<tc>, window_params = [{transform_indices = @transform_0, window_bounds = array<i64: 1, 4, 256>}, {pipeline_mode = #tpu.pipeline_mode<synchronous>, transform_indices = @transform_1, window_bounds = array<i64: 8, 28>}, {pipeline_mode = #tpu.pipeline_mode<synchronous>, transform_indices = @transform_2, window_bounds = array<i64: 8, 1>}, {transform_indices = @transform_3, window_bounds = array<i64: 1, 8, 64>}]} {
    %c0 = arith.constant 0 : index
    %c0_0 = arith.constant 0 : index
    %c0_1 = arith.constant 0 : index
    %0 = vector.load %arg2[%c0, %c0_0, %c0_1] : memref<1x4x256xf32, #tpu.memory_space<vmem>>, vector<1x4x256xf32>
    %1 = vector.shape_cast %0 : vector<1x4x256xf32> to vector<4x256xf32>
    %2 = vector.extract_strided_slice %1 {offsets = [0, 2], sizes = [4, 254], strides = [1, 1]} : vector<4x256xf32> to vector<4x254xf32>
    %3 = vector.extract_strided_slice %1 {offsets = [0, 0], sizes = [4, 2], strides = [1, 1]} : vector<4x256xf32> to vector<4x2xf32>
    %4 = tpu.concatenate %2, %3 in 1 : vector<4x254xf32>, vector<4x2xf32> -> vector<4x256xf32>
    %5 = vector.extract_strided_slice %1 {offsets = [0, 4], sizes = [4, 252], strides = [1, 1]} : vector<4x256xf32> to vector<4x252xf32>
    %6 = vector.extract_strided_slice %1 {offsets = [0, 0], sizes = [4, 4], strides = [1, 1]} : vector<4x256xf32> to vector<4x4xf32>
    %7 = tpu.concatenate %5, %6 in 1 : vector<4x252xf32>, vector<4x4xf32> -> vector<4x256xf32>
    %8 = vector.extract_strided_slice %1 {offsets = [0, 6], sizes = [4, 250], strides = [1, 1]} : vector<4x256xf32> to vector<4x250xf32>
    %9 = vector.extract_strided_slice %1 {offsets = [0, 0], sizes = [4, 6], strides = [1, 1]} : vector<4x256xf32> to vector<4x6xf32>
    %10 = tpu.concatenate %8, %9 in 1 : vector<4x250xf32>, vector<4x6xf32> -> vector<4x256xf32>
    %11 = vector.extract_strided_slice %1 {offsets = [0, 8], sizes = [4, 248], strides = [1, 1]} : vector<4x256xf32> to vector<4x248xf32>
    %12 = vector.extract_strided_slice %1 {offsets = [0, 0], sizes = [4, 8], strides = [1, 1]} : vector<4x256xf32> to vector<4x8xf32>
    %13 = tpu.concatenate %11, %12 in 1 : vector<4x248xf32>, vector<4x8xf32> -> vector<4x256xf32>
    %14 = vector.extract_strided_slice %1 {offsets = [0, 10], sizes = [4, 246], strides = [1, 1]} : vector<4x256xf32> to vector<4x246xf32>
    %15 = vector.extract_strided_slice %1 {offsets = [0, 0], sizes = [4, 10], strides = [1, 1]} : vector<4x256xf32> to vector<4x10xf32>
    %16 = tpu.concatenate %14, %15 in 1 : vector<4x246xf32>, vector<4x10xf32> -> vector<4x256xf32>
    %17 = vector.extract_strided_slice %1 {offsets = [0, 12], sizes = [4, 244], strides = [1, 1]} : vector<4x256xf32> to vector<4x244xf32>
    %18 = vector.extract_strided_slice %1 {offsets = [0, 0], sizes = [4, 12], strides = [1, 1]} : vector<4x256xf32> to vector<4x12xf32>
    %19 = tpu.concatenate %17, %18 in 1 : vector<4x244xf32>, vector<4x12xf32> -> vector<4x256xf32>
    %20 = tpu.concatenate %1, %4, %7, %10, %13, %16, %19 in 0 : vector<4x256xf32>, vector<4x256xf32>, vector<4x256xf32>, vector<4x256xf32>, vector<4x256xf32>, vector<4x256xf32>, vector<4x256xf32> -> vector<28x256xf32>
    %c0_2 = arith.constant 0 : index
    %c0_3 = arith.constant 0 : index
    %21 = vector.load %arg3[%c0_2, %c0_3] : memref<8x28xf32, #tpu.memory_space<vmem>>, vector<8x28xf32>
    %cst = arith.constant dense<0.000000e+00> : vector<8x256xf32>
    %22 = tpu.matmul %21, %20, %cst {dimension_numbers = #tpu.dot_dimension_numbers<[1], [0], [0], [1], [0, 0, 1, 1], [], []>} : vector<8x28xf32>, vector<28x256xf32>, vector<8x256xf32> -> vector<8x256xf32>
    %23 = vector.extract_strided_slice %22 {offsets = [0, 0], sizes = [8, 4], strides = [1, 1]} : vector<8x256xf32> to vector<8x4xf32>
    %24 = vector.extract_strided_slice %22 {offsets = [0, 16], sizes = [8, 4], strides = [1, 1]} : vector<8x256xf32> to vector<8x4xf32>
    %25 = vector.extract_strided_slice %22 {offsets = [0, 32], sizes = [8, 4], strides = [1, 1]} : vector<8x256xf32> to vector<8x4xf32>
    %26 = vector.extract_strided_slice %22 {offsets = [0, 48], sizes = [8, 4], strides = [1, 1]} : vector<8x256xf32> to vector<8x4xf32>
    %27 = vector.extract_strided_slice %22 {offsets = [0, 64], sizes = [8, 4], strides = [1, 1]} : vector<8x256xf32> to vector<8x4xf32>
    %28 = vector.extract_strided_slice %22 {offsets = [0, 80], sizes = [8, 4], strides = [1, 1]} : vector<8x256xf32> to vector<8x4xf32>
    %29 = vector.extract_strided_slice %22 {offsets = [0, 96], sizes = [8, 4], strides = [1, 1]} : vector<8x256xf32> to vector<8x4xf32>
    %30 = vector.extract_strided_slice %22 {offsets = [0, 112], sizes = [8, 4], strides = [1, 1]} : vector<8x256xf32> to vector<8x4xf32>
    %31 = vector.extract_strided_slice %22 {offsets = [0, 128], sizes = [8, 4], strides = [1, 1]} : vector<8x256xf32> to vector<8x4xf32>
    %32 = vector.extract_strided_slice %22 {offsets = [0, 144], sizes = [8, 4], strides = [1, 1]} : vector<8x256xf32> to vector<8x4xf32>
    %33 = vector.extract_strided_slice %22 {offsets = [0, 160], sizes = [8, 4], strides = [1, 1]} : vector<8x256xf32> to vector<8x4xf32>
    %34 = vector.extract_strided_slice %22 {offsets = [0, 176], sizes = [8, 4], strides = [1, 1]} : vector<8x256xf32> to vector<8x4xf32>
    %35 = vector.extract_strided_slice %22 {offsets = [0, 192], sizes = [8, 4], strides = [1, 1]} : vector<8x256xf32> to vector<8x4xf32>
    %36 = vector.extract_strided_slice %22 {offsets = [0, 208], sizes = [8, 4], strides = [1, 1]} : vector<8x256xf32> to vector<8x4xf32>
    %37 = vector.extract_strided_slice %22 {offsets = [0, 224], sizes = [8, 4], strides = [1, 1]} : vector<8x256xf32> to vector<8x4xf32>
    %38 = vector.extract_strided_slice %22 {offsets = [0, 240], sizes = [8, 4], strides = [1, 1]} : vector<8x256xf32> to vector<8x4xf32>
    %39 = tpu.concatenate %23, %24, %25, %26, %27, %28, %29, %30, %31, %32, %33, %34, %35, %36, %37, %38 in 1 : vector<8x4xf32>, vector<8x4xf32>, vector<8x4xf32>, vector<8x4xf32>, vector<8x4xf32>, vector<8x4xf32>, vector<8x4xf32>, vector<8x4xf32>, vector<8x4xf32>, vector<8x4xf32>, vector<8x4xf32>, vector<8x4xf32>, vector<8x4xf32>, vector<8x4xf32>, vector<8x4xf32>, vector<8x4xf32> -> vector<8x64xf32>
    %c0_4 = arith.constant 0 : index
    %c0_5 = arith.constant 0 : index
    %40 = vector.load %arg4[%c0_4, %c0_5] : memref<8x1xf32, #tpu.memory_space<vmem>>, vector<8x1xf32>
    %41 = vector.broadcast %40 : vector<8x1xf32> to vector<8x64xf32>
    %42 = arith.addf %39, %41 : vector<8x64xf32>
    %c0_6 = arith.constant 0 : index
    %c0_7 = arith.constant 0 : index
    %c0_8 = arith.constant 0 : index
    %43 = vector.load %arg5[%c0_6, %c0_7, %c0_8] : memref<1x8x64xf32, #tpu.memory_space<vmem>>, vector<1x8x64xf32>
    %44 = vector.shape_cast %43 : vector<1x8x64xf32> to vector<8x64xf32>
    %45 = vector.shape_cast %42 : vector<8x64xf32> to vector<1x8x64xf32>
    tpu.vector_store %arg5[%c0_6, %c0_7, %c0_8], %45 {strides = array<i32>} : memref<1x8x64xf32, #tpu.memory_space<vmem>>, vector<1x8x64xf32>,
    return
  }
  func.func @transform_0(%arg0: i32, %arg1: i32) -> (i32, i32, i32) {
    %c0_i32 = arith.constant 0 : i32
    %c0_i32_0 = arith.constant 0 : i32
    return %arg0, %c0_i32, %arg1 : i32, i32, i32
  }
  func.func @transform_1(%arg0: i32, %arg1: i32) -> (i32, i32) {
    %c0_i32 = arith.constant 0 : i32
    %c0_i32_0 = arith.constant 0 : i32
    %c0_i32_1 = arith.constant 0 : i32
    return %c0_i32, %c0_i32_0 : i32, i32
  }
  func.func @transform_2(%arg0: i32, %arg1: i32) -> (i32, i32) {
    %c0_i32 = arith.constant 0 : i32
    %c0_i32_0 = arith.constant 0 : i32
    %c0_i32_1 = arith.constant 0 : i32
    return %c0_i32, %c0_i32_0 : i32, i32
  }
  func.func @transform_3(%arg0: i32, %arg1: i32) -> (i32, i32, i32) {
    %c0_i32 = arith.constant 0 : i32
    %c0_i32_0 = arith.constant 0 : i32
    return %arg0, %c0_i32, %arg1 : i32, i32, i32
  }
}

</mosaic_0001>

<bundles_post_ra>
// kernel: tpu_custom_call.1
= control target key start
LH: loop header
LB: loop body
LE: loop exit
PB: predicated region body
PF: predicated region fallthrough
CT: control target
= control target key end

     0   :  { %8 = vsyncpa [#allocation3], 0  ;;  %s1063_s0 = inlined_call_operand.hbm [shape: f32[2,4,256], index: 0, kind: input, shape index: {}]   ;;  %s1064_s1 = inlined_call_operand.vmem [shape: f32[8,28], index: 1, kind: input, shape index: {}]   ;;  %s1065_s2 = inlined_call_operand.vmem [shape: f32[8,1], index: 2, kind: input, shape index: {}]   ;;  %s1066_s3 = inlined_call_operand.hbm [shape: f32[2,8,64], index: 3, kind: output, shape index: {}]  }
   0x1   :  { %10 = vsyncpa [#allocation3 + $0x1], 0 }
   0x2   :  { %11 = vsyncpa [#allocation4], 0 }
   0x3   :  { %13 = vsyncpa [#allocation4 + $0x1], 0  ;;  %s854_s12 = smov 0   ;;  %s856_s13 = smov 0  }
   0x4   :  { %s858_s14 = smov 0   ;;  %s860_s15 = smov 0  }
   0x5   :  { %s862_s16 = smov 0   ;;  %s864_s17 = smov 0  }
   0x6 LB: > { %s551_s18 = sadd.s32 4294967295, %s808_s17   ;;  %s552_s19 = sadd.s32 4294967294, %s808_s17   ;;  %s808_s17 = sphi %s864_s17, %s19_s17   ;;  %s804_s16 = sphi %s862_s16, %s1082_s16   ;;  %s800_s15 = sphi %s860_s15, %s1081_s15   ;;  %s796_s14 = sphi %s858_s14, %s1080_s14   ;;  %s792_s13 = sphi %s856_s13, %s1079_s13   ;;  %s788_s12 = sphi %s854_s12, %s1078_s12  }
   0x7   : > { %s31_s20 = sadd.s32 1, %s804_s16  ;;  %s40_s21 = sadd.s32 1, %s796_s14 }
   0x8   : > { %p33_p0 = scmp.ge.s32.totalorder %s31_s20, 2  ;;  %p47_p1 = scmp.ne.s32.totalorder %s796_s14, %s792_s13 }
   0x9   : > { %p48_p2 = scmp.eq.s32.totalorder %s808_s17, 0  ;;  %p53_p3 = scmp.ne.s32.totalorder %s792_s13, %s788_s12 }
   0xa   : > { %s1084_s20 = smov (%p33_p0, %s31_s20), 0  ;;  %p54_p5 = scmp.eq.s32.totalorder %s551_s18, 0 }
   0xb   : > { %p895_p4 = por %p48_p2, %p47_p1  ;;  %s35_s23 = ssub.s32 %s804_s16, %s1084_s20 }
   0xc   : > { %p121_p6 = scmp.eq.s32.totalorder %s551_s18, 1  ;;  %p38_p7 = scmp.eq.s32.totalorder %s35_s23, 0 }
   0xd   : > { %p901_p8 = por %p54_p5, %p53_p3  ;;  %p127_p10 = scmp.eq.s32.totalorder %s552_s19, 1 }
   0xe   : > { %p905_p9 = por %p121_p6, %p47_p1  ;;  %p591_p13 = scmp.lt.s32.totalorder %s808_s17, 2 }
   0xf   : > { %s910_s26 = scalar_select %p38_p7, %s796_s14, %s40_s21  }
  0x10   : > { %s1070_s25 = scalar_select %p905_p9, 1, 0 }
  0x11   : > { %p912_p11 = por %p127_p10, %p53_p3  ;;  %s153_s28 = sand.u32 1, %s796_s14  }
  0x12   : > { %s555_s29 = sshll.u32 %s153_s28, 3  ;;  %s568_s30 = sshll.u32 %s804_s16, 7 }
  0x13   : > { %s1071_s27 = scalar_select %p912_p11, 1, 0 }
  0x14   : > { %s923_s6 = scalar_lea.hbm %s1063_s0, %s568_s30  ;;  %s157_s7 = scalar_lea.vmem [#allocation2], %s555_s29 }
  0x15   : > { %s167_s8 = sshll.u32 %s157_s7, 4  ;;  %p929_p0 = pnand %p591_p13, %p895_p4  ;;  %s925_s8 = int_to_ptr.vmem [resolvable:$true] %s167_s8 }
  0x16   : > { %s154_s10 = scalar_lea.sflag [#allocation3], %s153_s28  ;;  %s696_s11 = scalar_lea.hbm %s923_s6, 128 }
  0x17   : > { %p697_p3 = scmp.ne.s32.totalorder %s923_s6, %s696_s11  ;;  %p698_p5 = pneg %p929_p0 }
  0x18   : > { %s701_s21 = scalar_lea.hbm %s1063_s0, 256  ;;  %p702_p4 = scmp.lt.u32.totalorder %s923_s6, %s1063_s0 }
  0x19   : > { %p699_p6 = pnand %p698_p5, %p697_p3  ;;  %p703_p10 = scmp.lt.u32.totalorder %s701_s21, %s696_s11 }
  0x1a   : > { %p705_p12 = scmp.lt.u32.totalorder %s696_s11, %s923_s6 }
  0x1b   : > { %p700_p7 = pneg %p699_p6  ;;  %p704_p13 = por %p703_p10, %p702_p4 }
  0x1d   : > { %p706_p1 = por %p705_p12, %p704_p13 }
  0x1f   : > { %p707_p2 = pnand %p706_p1, %p700_p7 }
  0x21   : > { %710 = shalt.err (!%p707_p2)
}
  0x22   : > { %s711_s28 = scalar_lea.vmem %s925_s8, 128  ;;  %s810_s29 = smov [#allocation2]  }
  0x23   : > { %p712_p3 = scmp.ne.s32.totalorder %s925_s8, %s711_s28  ;;  %s716_s30 = sshll.u32 %s810_s29, 4  ;;  %s717_s30 = int_to_ptr.vmem [resolvable:$false] %s716_s30 }
  0x24   : > { %s718_s4 = scalar_lea.vmem %s717_s30, 256  ;;  %p719_p9 = scmp.lt.s32.totalorder %s925_s8, %s717_s30 }
  0x25   : > { %p714_p6 = pnand %p712_p3, %p698_p5  ;;  %p720_p4 = scmp.lt.s32.totalorder %s718_s4, %s711_s28 }
  0x27   : > { %p715_p11 = pneg %p714_p6  ;;  %p721_p10 = por %p720_p4, %p719_p9 }
  0x29   : > { %p722_p12 = pnand %p721_p10, %p715_p11 }
  0x2b   : > { %725 = shalt.err (!%p722_p12)
}
  0x2c   : > { %586 = dma.hbm_to_vmem [thread:$0]  (!%p929_p0), %s923_s6, 128, %s925_s8, %s154_s10  }
  0x2d   : > { %p1073_p1 = scmp.lt.s32.totalorder %s808_s17, 3  ;;  %p1074_p2 = scmp.ge.s32.totalorder %s808_s17, 1 }
  0x2f   : > { %p173_p5 = pnand %p1074_p2, %p1073_p1 }
  0x30   : > { %s965_s5 = sand.u32 (!%p173_p5), 1, %s792_s13  }
  0x31   : > { %176 = sbr.rel (%p173_p5) target bundleno = 570 (0x23a), region = 32  ;;  %s559_s7 = sshll.u32 (!%p173_p5), %s965_s5, 3 }
  0x32   : > { %s179_s11 = scalar_lea.sflag (!%p173_p5), [#allocation3], %s965_s5  ;;  %s182_s9 = scalar_lea.vmem (!%p173_p5), [#allocation2], %s559_s7 }
  0x38   : > { %779 = dma.done.wait (%p901_p8), %s179_s11, 128  }
  0x39   : > { %781 = vsyncadd (%p901_p8), %s179_s11, 4294967168  ;;  %v975_v0 = vld [vmem:[%s182_s9] sm:$0xff]  ;;  %s811_s6 = smov 126   ;;  %s812_s8 = smov 124   ;;  %v815_v3 = vmov 0.0   ;;  %v818_v4 = vmov 0  }
  0x3a   : > { %v208_v1 = vcombine.high %v975_v0, %v975_v0  ;;  %s813_s10 = smov 122   ;;  %s814_s18 = smov 118   ;;  %362 = vmatprep.mubr.f32.mxu0 %v815_v3  ;;  %693 = vset.pattern.permute.xlu1 %v818_v4  ;;  %v445_v5 = vld [vmem:[%s1065_s2] sm:$0xff]  ;;  %vm213_vm0 = vcmask 1031168   ;;  %vm232_vm1 = vcmask 998400   ;;  %vm222_vm2 = vcmask 1014784  }
  0x3b   : > { %s816_s24 = smov 120   ;;  %s817_s19 = smov 116   ;;  %694 = vset.pattern.permute.xlu0 %v818_v4  ;;  %vm251_vm3 = vcmask 965632   ;;  %vm241_vm4 = vcmask 982016   ;;  %vm260_vm5 = vcmask 949248   ;;  %vm281_vm6 = vcmask 1043456  }
  0x3c   : > { %v663_v2 = vpack.i.bf16 %v208_v1, %v975_v0  ;;  %vm819_vm7 = vmmov 1   ;;  %v288_v52 = vld [vmem:[%s1064_s1] sm:$0xff]  ;;  %vm289_vm9 = vcmask 228352   ;;  %s820_s29 = smov 104   ;;  %s821_s30 = smov 80   ;;  %vm416_vm10 = vcmask 31744  }
  0x3d   : > { %vm574_vm8 = vmpackc.low %vm281_vm6, %vm819_vm7  ;;  %s822_s4 = smov 92   ;;  %s823_s11 = smov 56   ;;  %vm418_vm11 = vcmask 64512   ;;  %vm420_vm12 = vcmask 97280   ;;  %vm422_vm13 = vcmask 130048   ;;  %vm424_vm14 = vcmask 162816  }
  0x3e   : > { %664 = vrot.lane.b32.xlu0 %v663_v2, %s811_s6  ;;  %674 = vrot.lane.b32.xlu1 %v663_v2, %s812_s8  ;;  %s824_s9 = smov 68   ;;  %s825_s6 = smov 44   ;;  %vm426_vm15 = vcmask 195584   ;;  %vm443_vm7 = vcmask 490496  }
  0x3f   : > { %s830_s21 = smov 112   ;;  %s831_s22 = smov 76  }
  0x40   : > { %s832_s23 = smov 88   ;;  %s204_s28 = scalar_lea.vmem [#allocation5], %s559_s7 }
  0x41   : > { %p1075_p9 = scmp.ne.s32.totalorder %s1070_s25, 0  ;;  %s833_s7 = smov [#allocation5]  }
  0x42   : > { %669 = vrot.lane.b32.xlu0 %v663_v2, %s813_s10  ;;  %679 = vrot.lane.b32.xlu1 %v663_v2, %s814_s18  ;;  %s826_s10 = smov 32   ;;  %s827_s18 = smov 20  }
  0x46   : > { %684 = vrot.lane.b32.xlu0 %v663_v2, %s816_s24  ;;  %689 = vrot.lane.b32.xlu1 %v663_v2, %s817_s19  ;;  %s828_s24 = smov 8  }
  0x4a   : > { %448 = vperm.xlu1 %693, %v445_v5  }
  0xb0   : > { %v665_v6 = vpop.permute.xlu0 %664  ;;  %v675_v7 = vpop.permute.xlu1 %674 }
  0xb1   : > { %v667_v8 = vunpack.i.h.bf16 %v665_v6  ;;  %v666_v9 = vunpack.i.l.bf16 %v665_v6  ;;  %v677_v10 = vunpack.i.h.bf16 %v675_v7  ;;  %v676_v11 = vunpack.i.l.bf16 %v675_v7 }
  0xb3   : > { %v214_v12 = vsel %vm213_vm0, %v666_v9, %v667_v8  ;;  %v217_v13 = vsel %vm213_vm0, %v667_v8, %v666_v9  ;;  %v227_v21 = vsel %vm222_vm2, %v677_v10, %v676_v11  ;;  %v223_v32 = vsel %vm222_vm2, %v676_v11, %v677_v10 }
  0xb4   : > { %v670_v14 = vpop.permute.xlu0 %669  ;;  %v680_v15 = vpop.permute.xlu1 %679  ;;  %v267_v20 = vrot.slane %v214_v12, 4  ;;  %v268_v22 = vrot.slane %v217_v13, 4  ;;  %vm429_vm0 = vcmask 261120   ;;  %vm433_vm2 = vcmask 326656  }
  0xb5   : > { %v672_v16 = vunpack.i.h.bf16 %v670_v14  ;;  %v671_v17 = vunpack.i.l.bf16 %v670_v14  ;;  %v682_v18 = vunpack.i.h.bf16 %v680_v15  ;;  %v681_v19 = vunpack.i.l.bf16 %v680_v15 }
  0xb6   : > { %v283_v38 = vsel %vm281_vm6, %v208_v1, %v268_v22  ;;  %v282_v44 = vsel %vm281_vm6, %v975_v0, %v267_v20 }
  0xb7   : > { %v233_v23 = vsel %vm232_vm1, %v671_v17, %v672_v16  ;;  %v252_v24 = vsel %vm251_vm3, %v681_v19, %v682_v18  ;;  %v255_v25 = vsel %vm251_vm3, %v682_v18, %v681_v19  ;;  %v236_v26 = vsel %vm232_vm1, %v672_v16, %v671_v17 }
  0xb8   : > { %v272_v27 = vrot.slane %v233_v23, 4  ;;  %v278_v28 = vrot.slane %v255_v25, 4  ;;  %v685_v29 = vpop.permute.xlu0 %684  ;;  %v690_v30 = vpop.permute.xlu1 %689  ;;  %v273_v31 = vrot.slane %v236_v26, 4  ;;  %v277_v37 = vrot.slane %v252_v24, 4 }
  0xb9   : > { %v687_v33 = vunpack.i.h.bf16 %v685_v29  ;;  %v686_v34 = vunpack.i.l.bf16 %v685_v29  ;;  %v692_v35 = vunpack.i.h.bf16 %v690_v30  ;;  %v691_v36 = vunpack.i.l.bf16 %v690_v30 }
  0xba   : > { %v285_v39 = vsel %vm281_vm6, %v227_v21, %v273_v31  ;;  %v284_v40 = vsel %vm281_vm6, %v223_v32, %v272_v27  ;;  %vm431_vm1 = vcmask 293888   ;;  %vm435_vm3 = vcmask 359424  }
  0xbb   : > { %v242_v41 = vsel %vm241_vm4, %v686_v34, %v687_v33  ;;  %v246_v42 = vsel %vm241_vm4, %v687_v33, %v686_v34  ;;  %v264_v43 = vsel %vm260_vm5, %v692_v35, %v691_v36  ;;  %v569_v46 = vpack.c.bf16 %v285_v39, %v283_v38 }
  0xbc   : > { %v287_v45 = vsel %vm281_vm6, %v246_v42, %v278_v28  ;;  %v571_v47 = vpack.c.bf16 %v284_v40, %v282_v44  ;;  %v261_v49 = vsel %vm260_vm5, %v691_v36, %v692_v35  ;;  %v286_v50 = vsel %vm281_vm6, %v242_v41, %v277_v37 }
  0xbd   : > { %v573_v48 = vpack.c.bf16 %v264_v43, %v287_v45  ;;  %570 = vmatprep.subr.bf16.mxu0 %v569_v46  ;;  %v576_v51 = vpack.c.bf16 %v261_v49, %v286_v50  ;;  %vm437_vm4 = vcmask 392192   ;;  %vm439_vm5 = vcmask 424960  }
  0xbe   : > { %572 = vmatpush1.bf16.msra.mxu0 %v571_v47  ;;  %vm441_vm6 = vcmask 457728  }
  0xbf   : > { %575 = vmatprep.subr.msk.bf16.mxu0 %vm574_vm8, %v573_v48 }
  0xc2   : > { %578 = vmatpush1.bf16.msk.msra.mxu0 %vm574_vm8, %v576_v51  ;;  %vm452_vm8 = vcmask 523264  }
  0xc5   : > { %563 = vmatmul.mubr.msk.f32.vlgmr.msra.gmra.mrb[0].mxu0 %vm289_vm9, %v288_v52 }
  0xc9   : > { %v449_v55 = vpop.permute.xlu1 %448 }
 0x198   : > { %v364_v53 = vpop.f32.mrb[0].mxu0 }
 0x199   : > { %373 = vrot.lane.b32.xlu1 %v364_v53, %s820_s29  ;;  %370 = vrot.lane.b32.xlu0 %v364_v53, %s817_s19  ;;  %v366_v54 = vpop.f32.mrb[1].mxu0  ;;  %s829_s19 = smov 100   ;;  %s469_s29 = sshll.u32 %s204_s28, 4  ;;  %s1016_s29 = int_to_ptr.vmem [resolvable:$true] %s469_s29 }
 0x19d   : > { %379 = vrot.lane.b32.xlu1 %v364_v53, %s821_s30  ;;  %376 = vrot.lane.b32.xlu0 %v364_v53, %s822_s4 }
 0x1a1   : > { %385 = vrot.lane.b32.xlu1 %v364_v53, %s823_s11  ;;  %382 = vrot.lane.b32.xlu0 %v364_v53, %s824_s9  ;;  %s726_s9 = scalar_lea.vmem %s1016_s29, 128 }
 0x1a2   : > { %p727_p8 = scmp.ne.s32.totalorder %s1016_s29, %s726_s9 }
 0x1a4   : > { %p728_p11 = pnand %p727_p8, %p1075_p9 }
 0x1a5   : > { %388 = vrot.lane.b32.xlu0 %v364_v53, %s825_s6  ;;  %392 = vrot.lane.b32.xlu1 %v366_v54, %s826_s10  ;;  %s730_s6 = sshll.u32 %s833_s7, 4  ;;  %s731_s6 = int_to_ptr.vmem [resolvable:$false] %s730_s6 }
 0x1a6   : > { %p729_p0 = pneg %p728_p11  ;;  %s732_s10 = scalar_lea.vmem %s731_s6, 256 }
 0x1a7   : > { %p733_p7 = scmp.lt.s32.totalorder %s1016_s29, %s731_s6  ;;  %p734_p13 = scmp.lt.s32.totalorder %s732_s10, %s726_s9 }
 0x1a9   : > { %395 = vrot.lane.b32.xlu0 %v366_v54, %s827_s18  ;;  %401 = vrot.lane.b32.xlu1 %v366_v54, %s812_s8  ;;  %s565_s8 = sshll.u32 %s800_s15, 7  ;;  %s455_s15 = scalar_lea.sflag [#allocation4], %s965_s5 }
 0x1aa   : > { %s1014_s11 = scalar_lea.hbm %s1066_s3, %s565_s8  ;;  %p735_p3 = por %p734_p13, %p733_p7 }
 0x1ac   : > { %p736_p6 = pnand %p735_p3, %p729_p0 }
 0x1ad   : > { %398 = vrot.lane.b32.xlu0 %v366_v54, %s828_s24  ;;  %407 = vrot.lane.b32.xlu1 %v366_v54, %s829_s19 }
 0x1b1   : > { %404 = vrot.lane.b32.xlu0 %v366_v54, %s830_s21  ;;  %413 = vrot.lane.b32.xlu1 %v366_v54, %s831_s22 }
 0x1b5   : > { %410 = vrot.lane.b32.xlu0 %v366_v54, %s832_s23 }
 0x20b   : > { %v374_v56 = vpop.permute.xlu1 %373  ;;  %v371_v57 = vpop.permute.xlu0 %370 }
 0x20c   : > { %v417_v58 = vsel %vm416_vm10, %v364_v53, %v371_v57 }
 0x20d   : > { %v419_v61 = vsel %vm418_vm11, %v417_v58, %v374_v56 }
 0x20f   : > { %v380_v59 = vpop.permute.xlu1 %379  ;;  %v377_v60 = vpop.permute.xlu0 %376 }
 0x210   : > { %v421_v62 = vsel %vm420_vm12, %v419_v61, %v377_v60 }
 0x211   : > { %v423_v1 = vsel %vm422_vm13, %v421_v62, %v380_v59 }
 0x213   : > { %v386_v63 = vpop.permute.xlu1 %385  ;;  %v383_v0 = vpop.permute.xlu0 %382 }
 0x214   : > { %v425_v2 = vsel %vm424_vm14, %v423_v1, %v383_v0 }
 0x215   : > { %v427_v5 = vsel %vm426_vm15, %v425_v2, %v386_v63 }
 0x217   : > { %v389_v3 = vpop.permute.xlu0 %388  ;;  %v393_v4 = vpop.permute.xlu1 %392 }
 0x218   : > { %v428_v6 = vsel %vm289_vm9, %v427_v5, %v389_v3 }
 0x219   : > { %v430_v9 = vsel %vm429_vm0, %v428_v6, %v393_v4 }
 0x21b   : > { %v396_v7 = vpop.permute.xlu0 %395  ;;  %v402_v8 = vpop.permute.xlu1 %401 }
 0x21c   : > { %v432_v10 = vsel %vm431_vm1, %v430_v9, %v396_v7 }
 0x21f   : > { %v399_v11 = vpop.permute.xlu0 %398  ;;  %v408_v13 = vpop.permute.xlu1 %407 }
 0x220   : > { %v434_v12 = vsel %vm433_vm2, %v432_v10, %v399_v11 }
 0x221   : > { %v436_v15 = vsel %vm435_vm3, %v434_v12, %v402_v8 }
 0x223   : > { %v405_v14 = vpop.permute.xlu0 %404  ;;  %v414_v19 = vpop.permute.xlu1 %413 }
 0x224   : > { %v438_v16 = vsel %vm437_vm4, %v436_v15, %v405_v14 }
 0x225   : > { %v440_v18 = vsel %vm439_vm5, %v438_v16, %v408_v13 }
 0x227   : > { %v411_v17 = vpop.permute.xlu0 %410 }
 0x228   : > { %v442_v20 = vsel %vm441_vm6, %v440_v18, %v411_v17 }
 0x229   : > { %v444_v21 = vsel %vm443_vm7, %v442_v20, %v414_v19 }
 0x22a   : > { %v451_v22 = vadd.f32 %v449_v55, %v444_v21 }
 0x22c   : > { %453 = vst.msk [vmem:[%s204_s28] sm:$0xff] %vm452_vm8, %v451_v22 }
 0x22d   : > { %739 = shalt.err (!%p736_p6)
}
 0x22e   : > { %s740_s5 = scalar_lea.hbm %s1014_s11, 128  ;;  %s744_s19 = scalar_lea.hbm %s1066_s3, 256 }
 0x22f   : > { %p741_p4 = scmp.ne.s32.totalorder %s1014_s11, %s740_s5  ;;  %p745_p1 = scmp.lt.u32.totalorder %s1014_s11, %s1066_s3 }
 0x230   : > { %p746_p2 = scmp.lt.u32.totalorder %s744_s19, %s740_s5  ;;  %p748_p8 = scmp.lt.u32.totalorder %s740_s5, %s1014_s11 }
 0x231   : > { %p742_p10 = pnand %p741_p4, %p1075_p9 }
 0x232   : > { %p747_p5 = por %p746_p2, %p745_p1 }
 0x233   : > { %p743_p12 = pneg %p742_p10 }
 0x234   : > { %p749_p11 = por %p748_p8, %p747_p5 }
 0x236   : > { %p750_p0 = pnand %p749_p11, %p743_p12 }
 0x238   : > { %753 = shalt.err (!%p750_p0)
}
 0x239   : > { %581 = dma.vmem_to_hbm [thread:$0]  (%p1075_p9), %s1016_s29, 128, %s1014_s11, %s455_s15  }
 0x23a PF: > { %s481_s23 = sand.u32 1, %s788_s12   ;;  %p1076_p7 = scmp.ne.s32.totalorder %s1071_s27, 0 }
 0x23b   : > { %p1077_p13 = scmp.ge.s32.totalorder %s808_s17, 2  ;;  %s482_s8 = scalar_lea.sflag [#allocation4], %s481_s23 }
 0x23d   : > { %p588_p3 = pnand %p1077_p13, %p1076_p7 }
 0x23f   : > { %783 = dma.done.wait (!%p588_p3), %s482_s8, 128  }
 0x240   : > { %785 = vsyncadd (!%p588_p3), %s482_s8, 4294967168  ;;  %s19_s17 = sadd.s32 1, %s808_s17   ;;  %s1078_s12 = smov %s792_s13 }
 0x241   : > { %p16_p6 = scmp.ge.s32.totalorder %s19_s17, 4   ;;  %s1079_s13 = smov %s796_s14 }
 0x242   : > { %s1080_s14 = smov %s910_s26  ;;  %s1081_s15 = smov %s804_s16 }
 0x243   : > { %s1082_s16 = smov %s1084_s20  ;;  %18 = sbr.rel (!%p16_p6) target bundleno = 6 (0x6), region = 77 }
 0x24a   :  { %487 = vsyncpa [#allocation3], 1 }
 0x24b   :  { %489 = vsyncpa [#allocation3 + $0x1], 1 }
 0x24c   :  { %490 = vsyncpa [#allocation4], 1 }
 0x24d   :  { %492 = vsyncpa [#allocation4 + $0x1], 1 }

</bundles_post_ra>
